<compile_context>
chip_gen: v7x
topology: tpu7x:2x2x1
jax: 0.10.0
libtpu: 0.0.40
codegen_flags: <defaults>
</compile_context>

<pallas_src>
import numpy as np
import jax
import jax.numpy as jnp
from jax import lax
from jax.experimental import pallas as pl
from jax.experimental.pallas import tpu as pltpu

# -------- small synthetic shapes consistent with the module -----------------
B            = 2        # batch of images
C_FEAT       = 32       # resnet.layer4[2].conv3.out_channels (2048 in real CUB)
FEAT_HW      = 4        # spatial side of the final resnet feature map
P            = FEAT_HW * FEAT_HW   # vision_num_patches = 16
H            = 128      # encoder.config.hidden_size
L            = 8        # definition token sequence length
N_DEFS       = 16       # number of definition sentences
N_CLASSES    = 200      # CUB-200 (hard-coded in forward)
N_CLASSES_PAD = 256     # lane-dense padded class dim (sliced back to 200)
LEAKY_SLOPE  = 0.01     # nn.LeakyReLU default
COS_EPS      = 1e-8     # F.cosine_similarity default eps


def sinusoidal_init(num_embeddings, embedding_dim):
    """Exact numpy re-implementation of the torch sinusoidal_init."""
    pe = np.array(
        [[pos / np.power(10000, 2 * i / embedding_dim) for i in range(embedding_dim)]
         if pos != 0 else np.zeros(embedding_dim)
         for pos in range(num_embeddings)])
    pe[1:, 0::2] = np.sin(pe[1:, 0::2])
    pe[1:, 1::2] = np.cos(pe[1:, 1::2])
    return jnp.asarray(pe, dtype=jnp.float32)


# ----------------------------- fused Pallas kernel ---------------------------
def _fused_kernel(xv_ref, va_wt_ref, va_b_ref,
                  e_w1_ref, e_b1_ref, e_w2_ref, e_b2_ref,
                  gcls_ref, g_w1_ref, g_b1_ref, g_w2_ref, g_b2_ref,
                  onehot_ref, bias_ref, o_ref):
    """visual_adapter -> encoder MLP -> guideline MLP -> cosine head, fused."""
    def leaky(h):
        return jnp.where(h >= 0.0, h, LEAKY_SLOPE * h)

    # --- vision branch: visual_adapter on the CLS patch -----------------------
    # (pos-embedding row 0 is pre-folded into va_b; it is all zeros anyway)
    enc = (jnp.dot(xv_ref[...], va_wt_ref[...],
                   preferred_element_type=jnp.float32) + va_b_ref[...])      # (B, H)
    # encoder 'linear' feature layer: Linear(H,2H) -> LeakyReLU -> Linear(2H,H)
    he = leaky(jnp.dot(enc, e_w1_ref[...],
                       preferred_element_type=jnp.float32) + e_b1_ref[...])
    a = (jnp.dot(he, e_w2_ref[...],
                 preferred_element_type=jnp.float32) + e_b2_ref[...])        # (B, H)

    # --- guideline branch: 'linear' feature layer on CLS tokens only ----------
    hg = leaky(jnp.dot(gcls_ref[...], g_w1_ref[...],
                       preferred_element_type=jnp.float32) + g_b1_ref[...])
    g = (jnp.dot(hg, g_w2_ref[...],
                 preferred_element_type=jnp.float32) + g_b2_ref[...])        # (N_DEFS, H)

    # --- cosine similarity * 5 -------------------------------------------------
    # Per-norm clamp (matches torch ATen cosine_similarity); rsqrt runs on EUP.
    inv_na = lax.rsqrt(jnp.maximum(jnp.sum(a * a, axis=-1, keepdims=True),
                                   COS_EPS * COS_EPS))                        # (B, 1)
    inv_ng = lax.rsqrt(jnp.maximum(jnp.sum(g * g, axis=-1, keepdims=True),
                                   COS_EPS * COS_EPS))                        # (N_DEFS, 1)
    a_n = a * (5.0 * inv_na)       # fold the *5 into the row scaling
    g_n = g * inv_ng
    # Contract the shared last dim directly: no transpose of g needed.
    scores5 = lax.dot_general(a_n, g_n,
                              dimension_numbers=(((1,), (1,)), ((), ())),
                              preferred_element_type=jnp.float32)             # (B, N_DEFS)

    # --- per-class aggregation -------------------------------------------------
    # eval path: every class column c gets scores[:, def==c].sum(1) + offset.
    # The "-2" per definition and uniform_offset are pre-folded into bias_ref
    # (bias_c = offset - 2*count_c), so this is a single matmul + add.
    cls = jnp.dot(scores5, onehot_ref[...], preferred_element_type=jnp.float32)
    o_ref[...] = (cls + bias_ref[...]).astype(o_ref.dtype)                    # (B, 256)


def _fused_forward_call(x_vis, g_cls, p):
    vmem = pl.BlockSpec(memory_space=pltpu.MemorySpace.VMEM)
    return pl.pallas_call(
        _fused_kernel,
        out_shape=jax.ShapeDtypeStruct((B, N_CLASSES_PAD), jnp.float32),
        in_specs=[vmem] * 14,
        out_specs=vmem,
    )(x_vis, p["va_wt"], p["va_bias"],
      p["e_w1t"], p["e_b1"], p["e_w2t"], p["e_b2"],
      g_cls, p["g_w1t"], p["g_b1"], p["g_w2t"], p["g_b2"],
      p["onehot"], p["class_bias"])


# ------------------------------ forward glue ---------------------------------
@jax.jit
def guided_bert_cub_forward(prep, resnet_feature_map, guideline_last_hidden):
    # Vision branch consumes only encoder_outputs[:, 0]; since the adapter and
    # the 'linear' feature layer are pointwise per token, only the CLS patch
    # (spatial flat index 0) of the feature map matters.
    x_vis = resnet_feature_map[:, :, 0, 0]                 # (B, C_FEAT)
    # Guideline branch consumes only guideline_features[:, 0] (CLS token).
    g_cls = guideline_last_hidden[:, 0, :]                 # (N_DEFS, H)
    out = _fused_forward_call(x_vis, g_cls, prep)          # (B, 256) lane-dense
    return out[:, :N_CLASSES]                              # (B, 200)


def prepare_inference_params(params, definition_indices):
    """One-time host-side prep: padded one-hot, folded biases, reshapes."""
    onehot = (definition_indices[:, None]
              == jnp.arange(N_CLASSES_PAD, dtype=definition_indices.dtype)[None, :]
              ).astype(jnp.float32)                        # (N_DEFS, 256)
    counts = onehot.sum(axis=0)                            # defs per class
    class_bias = (params["uniform_offset"] - 2.0 * counts).reshape(1, N_CLASSES_PAD)
    va_bias = (params["va_b"] + params["pos_emb"][0]).reshape(1, H)  # pos row 0 = zeros
    return dict(
        va_wt=params["va_wt"], va_bias=va_bias,
        e_w1t=params["e_w1t"], e_b1=params["e_b1"].reshape(1, -1),
        e_w2t=params["e_w2t"], e_b2=params["e_b2"].reshape(1, -1),
        g_w1t=params["g_w1t"], g_b1=params["g_b1"].reshape(1, -1),
        g_w2t=params["g_w2t"], g_b2=params["g_b2"].reshape(1, -1),
        onehot=onehot, class_bias=class_bias,
    )


def init_params(key):
    ks = jax.random.split(key, 5)

    def lin(k, fan_in, fan_out):
        bound = 1.0 / np.sqrt(fan_in)
        kw, kb = jax.random.split(k)
        w = jax.random.uniform(kw, (fan_out, fan_in), jnp.float32, -bound, bound)
        b = jax.random.uniform(kb, (fan_out,), jnp.float32, -bound, bound)
        return w.T, b                       # store transposed (in, out)

    g_w1t, g_b1 = lin(ks[0], H, 2 * H)
    g_w2t, g_b2 = lin(ks[1], 2 * H, H)
    e_w1t, e_b1 = lin(ks[2], H, 2 * H)
    e_w2t, e_b2 = lin(ks[3], 2 * H, H)
    va_wt, va_b = lin(ks[4], C_FEAT, H)
    return dict(
        g_w1t=g_w1t, g_b1=g_b1, g_w2t=g_w2t, g_b2=g_b2,
        e_w1t=e_w1t, e_b1=e_b1, e_w2t=e_w2t, e_b2=e_b2,
        va_wt=va_wt, va_b=va_b,
        pos_emb=sinusoidal_init(P, H),
        uniform_offset=jnp.array([-2.0], dtype=jnp.float32),  # nn.Parameter(zeros(1)[0]-2)
    )


if __name__ == "__main__":
    key = jax.random.PRNGKey(0)
    pkey, k1, k2, k3 = jax.random.split(key, 4)
    params = init_params(pkey)

    # Synthetic stand-ins for the external backbones' outputs (see TODO above).
    resnet_feature_map = jax.random.normal(
        k1, (B, C_FEAT, FEAT_HW, FEAT_HW), jnp.float32)           # NCHW
    guideline_last_hidden = jax.random.normal(k2, (N_DEFS, L, H), jnp.float32)
    definition_indices = jax.random.randint(k3, (N_DEFS,), 0, N_CLASSES)

    prep = prepare_inference_params(params, definition_indices)

    out = guided_bert_cub_forward(prep, resnet_feature_map, guideline_last_hidden)
    out = jax.block_until_ready(out)
    assert out.shape == (B, N_CLASSES) and out.dtype == jnp.float32
    print("KERNEL_OK")
</pallas_src>

<mosaic_0001>
module attributes {stable_mosaic.version = 11 : i64} {
  func.func @_fused_kernel(%arg0: memref<2x32xf32, #tpu.memory_space<vmem>>, %arg1: memref<32x128xf32, #tpu.memory_space<vmem>>, %arg2: memref<1x128xf32, #tpu.memory_space<vmem>>, %arg3: memref<128x256xf32, #tpu.memory_space<vmem>>, %arg4: memref<1x256xf32, #tpu.memory_space<vmem>>, %arg5: memref<256x128xf32, #tpu.memory_space<vmem>>, %arg6: memref<1x128xf32, #tpu.memory_space<vmem>>, %arg7: memref<16x128xf32, #tpu.memory_space<vmem>>, %arg8: memref<128x256xf32, #tpu.memory_space<vmem>>, %arg9: memref<1x256xf32, #tpu.memory_space<vmem>>, %arg10: memref<256x128xf32, #tpu.memory_space<vmem>>, %arg11: memref<1x128xf32, #tpu.memory_space<vmem>>, %arg12: memref<16x256xf32, #tpu.memory_space<vmem>>, %arg13: memref<1x256xf32, #tpu.memory_space<vmem>>, %arg14: memref<2x256xf32, #tpu.memory_space<vmem>>) attributes {dimension_semantics = [], scalar_prefetch = 0 : i64, scratch_operands = 0 : i64, tpu.core_type = #tpu.core_type<tc>} {
    %c0 = arith.constant 0 : index
    %c0_0 = arith.constant 0 : index
    %0 = vector.load %arg0[%c0, %c0_0] : memref<2x32xf32, #tpu.memory_space<vmem>>, vector<2x32xf32>
    %c0_1 = arith.constant 0 : index
    %c0_2 = arith.constant 0 : index
    %1 = vector.load %arg1[%c0_1, %c0_2] : memref<32x128xf32, #tpu.memory_space<vmem>>, vector<32x128xf32>
    %cst = arith.constant dense<0.000000e+00> : vector<2x128xf32>
    %2 = tpu.matmul %0, %1, %cst {dimension_numbers = #tpu.dot_dimension_numbers<[1], [0], [0], [1], [0, 0, 1, 1], [], []>} : vector<2x32xf32>, vector<32x128xf32>, vector<2x128xf32> -> vector<2x128xf32>
    %c0_3 = arith.constant 0 : index
    %c0_4 = arith.constant 0 : index
    %3 = vector.load %arg2[%c0_3, %c0_4] : memref<1x128xf32, #tpu.memory_space<vmem>>, vector<1x128xf32>
    %4 = vector.broadcast %3 : vector<1x128xf32> to vector<2x128xf32>
    %5 = arith.addf %2, %4 : vector<2x128xf32>
    %c0_5 = arith.constant 0 : index
    %c0_6 = arith.constant 0 : index
    %6 = vector.load %arg3[%c0_5, %c0_6] : memref<128x256xf32, #tpu.memory_space<vmem>>, vector<128x256xf32>
    %cst_7 = arith.constant dense<0.000000e+00> : vector<2x256xf32>
    %7 = tpu.matmul %5, %6, %cst_7 {dimension_numbers = #tpu.dot_dimension_numbers<[1], [0], [0], [1], [0, 0, 1, 1], [], []>} : vector<2x128xf32>, vector<128x256xf32>, vector<2x256xf32> -> vector<2x256xf32>
    %c0_8 = arith.constant 0 : index
    %c0_9 = arith.constant 0 : index
    %8 = vector.load %arg4[%c0_8, %c0_9] : memref<1x256xf32, #tpu.memory_space<vmem>>, vector<1x256xf32>
    %9 = vector.broadcast %8 : vector<1x256xf32> to vector<2x256xf32>
    %10 = arith.addf %7, %9 : vector<2x256xf32>
    %cst_10 = arith.constant 0.000000e+00 : f32
    %11 = vector.broadcast %cst_10 : f32 to vector<2x256xf32>
    %12 = arith.cmpf oge, %10, %11 : vector<2x256xf32>
    %cst_11 = arith.constant 0.00999999977 : f32
    %13 = vector.broadcast %cst_11 : f32 to vector<2x256xf32>
    %14 = arith.mulf %13, %10 : vector<2x256xf32>
    %15 = arith.select %12, %10, %14 : vector<2x256xi1>, vector<2x256xf32>
    %c0_12 = arith.constant 0 : index
    %c0_13 = arith.constant 0 : index
    %16 = vector.load %arg5[%c0_12, %c0_13] : memref<256x128xf32, #tpu.memory_space<vmem>>, vector<256x128xf32>
    %cst_14 = arith.constant dense<0.000000e+00> : vector<2x128xf32>
    %17 = tpu.matmul %15, %16, %cst_14 {dimension_numbers = #tpu.dot_dimension_numbers<[1], [0], [0], [1], [0, 0, 1, 1], [], []>} : vector<2x256xf32>, vector<256x128xf32>, vector<2x128xf32> -> vector<2x128xf32>
    %c0_15 = arith.constant 0 : index
    %c0_16 = arith.constant 0 : index
    %18 = vector.load %arg6[%c0_15, %c0_16] : memref<1x128xf32, #tpu.memory_space<vmem>>, vector<1x128xf32>
    %19 = vector.broadcast %18 : vector<1x128xf32> to vector<2x128xf32>
    %20 = arith.addf %17, %19 : vector<2x128xf32>
    %c0_17 = arith.constant 0 : index
    %c0_18 = arith.constant 0 : index
    %21 = vector.load %arg7[%c0_17, %c0_18] : memref<16x128xf32, #tpu.memory_space<vmem>>, vector<16x128xf32>
    %c0_19 = arith.constant 0 : index
    %c0_20 = arith.constant 0 : index
    %22 = vector.load %arg8[%c0_19, %c0_20] : memref<128x256xf32, #tpu.memory_space<vmem>>, vector<128x256xf32>
    %cst_21 = arith.constant dense<0.000000e+00> : vector<16x256xf32>
    %23 = tpu.matmul %21, %22, %cst_21 {dimension_numbers = #tpu.dot_dimension_numbers<[1], [0], [0], [1], [0, 0, 1, 1], [], []>} : vector<16x128xf32>, vector<128x256xf32>, vector<16x256xf32> -> vector<16x256xf32>
    %c0_22 = arith.constant 0 : index
    %c0_23 = arith.constant 0 : index
    %24 = vector.load %arg9[%c0_22, %c0_23] : memref<1x256xf32, #tpu.memory_space<vmem>>, vector<1x256xf32>
    %25 = vector.broadcast %24 : vector<1x256xf32> to vector<16x256xf32>
    %26 = arith.addf %23, %25 : vector<16x256xf32>
    %cst_24 = arith.constant 0.000000e+00 : f32
    %27 = vector.broadcast %cst_24 : f32 to vector<16x256xf32>
    %28 = arith.cmpf oge, %26, %27 : vector<16x256xf32>
    %cst_25 = arith.constant 0.00999999977 : f32
    %29 = vector.broadcast %cst_25 : f32 to vector<16x256xf32>
    %30 = arith.mulf %29, %26 : vector<16x256xf32>
    %31 = arith.select %28, %26, %30 : vector<16x256xi1>, vector<16x256xf32>
    %c0_26 = arith.constant 0 : index
    %c0_27 = arith.constant 0 : index
    %32 = vector.load %arg10[%c0_26, %c0_27] : memref<256x128xf32, #tpu.memory_space<vmem>>, vector<256x128xf32>
    %cst_28 = arith.constant dense<0.000000e+00> : vector<16x128xf32>
    %33 = tpu.matmul %31, %32, %cst_28 {dimension_numbers = #tpu.dot_dimension_numbers<[1], [0], [0], [1], [0, 0, 1, 1], [], []>} : vector<16x256xf32>, vector<256x128xf32>, vector<16x128xf32> -> vector<16x128xf32>
    %c0_29 = arith.constant 0 : index
    %c0_30 = arith.constant 0 : index
    %34 = vector.load %arg11[%c0_29, %c0_30] : memref<1x128xf32, #tpu.memory_space<vmem>>, vector<1x128xf32>
    %35 = vector.broadcast %34 : vector<1x128xf32> to vector<16x128xf32>
    %36 = arith.addf %33, %35 : vector<16x128xf32>
    %37 = arith.mulf %20, %20 : vector<2x128xf32>
    %cst_31 = arith.constant dense<0.000000e+00> : vector<2xf32>
    %38 = vector.multi_reduction <add>, %37, %cst_31 [1] : vector<2x128xf32> to vector<2xf32>
    %39 = vector.shape_cast %38 : vector<2xf32> to vector<2x1xf32>
    %cst_32 = arith.constant 1.000000e-16 : f32
    %40 = vector.broadcast %cst_32 : f32 to vector<2x1xf32>
    %41 = arith.maximumf %39, %40 : vector<2x1xf32>
    %42 = math.rsqrt %41 : vector<2x1xf32>
    %43 = arith.mulf %36, %36 : vector<16x128xf32>
    %cst_33 = arith.constant dense<0.000000e+00> : vector<16xf32>
    %44 = vector.multi_reduction <add>, %43, %cst_33 [1] : vector<16x128xf32> to vector<16xf32>
    %45 = vector.shape_cast %44 : vector<16xf32> to vector<16x1xf32>
    %cst_34 = arith.constant 1.000000e-16 : f32
    %46 = vector.broadcast %cst_34 : f32 to vector<16x1xf32>
    %47 = arith.maximumf %45, %46 : vector<16x1xf32>
    %48 = math.rsqrt %47 : vector<16x1xf32>
    %cst_35 = arith.constant 5.000000e+00 : f32
    %49 = vector.broadcast %cst_35 : f32 to vector<2x1xf32>
    %50 = arith.mulf %49, %42 : vector<2x1xf32>
    %51 = vector.broadcast %50 : vector<2x1xf32> to vector<2x128xf32>
    %52 = arith.mulf %20, %51 : vector<2x128xf32>
    %53 = vector.broadcast %48 : vector<16x1xf32> to vector<16x128xf32>
    %54 = arith.mulf %36, %53 : vector<16x128xf32>
    %cst_36 = arith.constant dense<0.000000e+00> : vector<2x16xf32>
    %55 = tpu.matmul %52, %54, %cst_36 {dimension_numbers = #tpu.dot_dimension_numbers<[1], [1], [0], [0], [0, 0, 1, 0], [], []>} : vector<2x128xf32>, vector<16x128xf32>, vector<2x16xf32> -> vector<2x16xf32>
    %c0_37 = arith.constant 0 : index
    %c0_38 = arith.constant 0 : index
    %56 = vector.load %arg12[%c0_37, %c0_38] : memref<16x256xf32, #tpu.memory_space<vmem>>, vector<16x256xf32>
    %cst_39 = arith.constant dense<0.000000e+00> : vector<2x256xf32>
    %57 = tpu.matmul %55, %56, %cst_39 {dimension_numbers = #tpu.dot_dimension_numbers<[1], [0], [0], [1], [0, 0, 1, 1], [], []>} : vector<2x16xf32>, vector<16x256xf32>, vector<2x256xf32> -> vector<2x256xf32>
    %c0_40 = arith.constant 0 : index
    %c0_41 = arith.constant 0 : index
    %58 = vector.load %arg13[%c0_40, %c0_41] : memref<1x256xf32, #tpu.memory_space<vmem>>, vector<1x256xf32>
    %59 = vector.broadcast %58 : vector<1x256xf32> to vector<2x256xf32>
    %60 = arith.addf %57, %59 : vector<2x256xf32>
    %c0_42 = arith.constant 0 : index
    %c0_43 = arith.constant 0 : index
    %61 = vector.load %arg14[%c0_42, %c0_43] : memref<2x256xf32, #tpu.memory_space<vmem>>, vector<2x256xf32>
    tpu.vector_store %arg14[%c0_42, %c0_43], %60 {strides = array<i32>} : memref<2x256xf32, #tpu.memory_space<vmem>>, vector<2x256xf32>,
    return
  }
}

</mosaic_0001>

<bundles_post_ra>
// kernel: guided_bert_cub_forward.1
= control target key start
LH: loop header
LB: loop body
LE: loop exit
PB: predicated region body
PF: predicated region fallthrough
CT: control target
= control target key end

     0   :  { %19 = vsyncpa [#allocation3], 0  ;;  %s1526_s0 = inlined_call_operand.vmem [shape: f32[2,32], index: 0, kind: input, shape index: {}]   ;;  %s1527_s1 = inlined_call_operand.vmem [shape: f32[32,128], index: 1, kind: input, shape index: {}]   ;;  %s1528_s2 = inlined_call_operand.vmem [shape: f32[1,128], index: 2, kind: input, shape index: {}]   ;;  %s1529_s3 = inlined_call_operand.hbm [shape: f32[128,256], index: 3, kind: input, shape index: {}]   ;;  %s1530_s4 = inlined_call_operand.vmem [shape: f32[1,256], index: 4, kind: input, shape index: {}]   ;;  %s1531_s5 = inlined_call_operand.hbm [shape: f32[256,128], index: 5, kind: input, shape index: {}]   ;;  %s1532_s6 = inlined_call_operand.vmem [shape: f32[1,128], index: 6, kind: input, shape index: {}]   ;;  %s1533_s7 = inlined_call_operand.vmem [shape: f32[16,128], index: 7, kind: input, shape index: {}]   ;;  %s1534_s8 = inlined_call_operand.hbm [shape: f32[128,256], index: 8, kind: input, shape index: {}]   ;;  %s1535_s9 = inlined_call_operand.vmem [shape: f32[1,256], index: 9, kind: input, shape index: {}]   ;;  %s1536_s10 = inlined_call_operand.hbm [shape: f32[256,128], index: 10, kind: input, shape index: {}]   ;;  %s1537_s11 = inlined_call_operand.vmem [shape: f32[1,128], index: 11, kind: input, shape index: {}]   ;;  %s1538_s12 = inlined_call_operand.hbm [shape: f32[16,256], index: 12, kind: input, shape index: {}]   ;;  %s1539_s13 = inlined_call_operand.vmem [shape: f32[1,256], index: 13, kind: input, shape index: {}]   ;;  %s1540_s14 = inlined_call_operand.hbm [shape: f32[2,256], index: 14, kind: output, shape index: {}]  }
   0x1   :  { %20 = vsyncpa [#allocation6], 0 }
   0x2   :  { %21 = vsyncpa [#allocation9], 0 }
   0x3   :  { %22 = vsyncpa [#allocation4], 0  ;;  %s1297_s29 = smov [#allocation5]   ;;  %s1157_s17 = scalar_lea.hbm %s1531_s5, 4096 }
   0x4   :  { %s48_s30 = sshll.u32 %s1297_s29, 4  ;;  %p1158_p0 = scmp.ne.s32.totalorder %s1531_s5, %s1157_s17  ;;  %s49_s30 = int_to_ptr.vmem [resolvable:$true] %s48_s30 }
   0x5   :  { %p1161_p1 = scmp.lt.u32.totalorder %s1157_s17, %s1531_s5 }
   0x7   :  { %p1163_p2 = pnand %p1161_p1, %p1158_p0 }
   0x9   :  { %1166 = shalt.err (!%p1163_p2)
}
   0xa   :  { %s1167_s22 = scalar_lea.vmem %s49_s30, 4096  ;;  %p1172_p4 = scmp.lt.s32.totalorder %s49_s30, %s49_s30 }
   0xb   :  { %p1168_p3 = scmp.ne.s32.totalorder %s49_s30, %s1167_s22  ;;  %p1173_p5 = scmp.lt.s32.totalorder %s1167_s22, %s1167_s22 }
   0xd   :  { %p1174_p6 = por %p1173_p5, %p1172_p4 }
   0xf   :  { %p1175_p7 = pnand %p1174_p6, %p1168_p3 }
  0x11   :  { %1178 = shalt.err (!%p1175_p7)
}
  0x12   :  { %s1298_s23 = smov 128   ;;  %s1299_s24 = smov 8  }
  0x13   :  { %54 = dma.hbm_to_vmem [thread:$0]  %s1531_s5, 4096, %s49_s30, [#allocation6], %s1298_s23, %s1298_s23, %s1299_s24  }
  0x14   :  { %s1300_s27 = smov [#allocation8]   ;;  %s1301_s29 = smov [#allocation2]  }
  0x15   :  { %s78_s28 = sshll.u32 %s1300_s27, 4  ;;  %s34_s15 = sshll.u32 %s1301_s29, 4  ;;  %s79_s28 = int_to_ptr.vmem [resolvable:$true] %s78_s28  ;;  %s35_s15 = int_to_ptr.vmem [resolvable:$true] %s34_s15 }
  0x16   :  { %s1179_s18 = scalar_lea.hbm %s1536_s10, 4096 }
  0x17   :  { %p1180_p8 = scmp.ne.s32.totalorder %s1536_s10, %s1179_s18  ;;  %p1183_p9 = scmp.lt.u32.totalorder %s1179_s18, %s1536_s10 }
  0x19   :  { %p1185_p10 = pnand %p1183_p9, %p1180_p8 }
  0x1b   :  { %1188 = shalt.err (!%p1185_p10)
}
  0x1c   :  { %s1189_s5 = scalar_lea.vmem %s79_s28, 4096  ;;  %p1194_p12 = scmp.lt.s32.totalorder %s79_s28, %s79_s28 }
  0x1d   :  { %p1190_p11 = scmp.ne.s32.totalorder %s79_s28, %s1189_s5  ;;  %p1195_p13 = scmp.lt.s32.totalorder %s1189_s5, %s1189_s5 }
  0x1f   :  { %p1196_p0 = por %p1195_p13, %p1194_p12 }
  0x21   :  { %p1197_p1 = pnand %p1196_p0, %p1190_p11 }
  0x23   :  { %1200 = shalt.err (!%p1197_p1)
}
  0x24   :  { %84 = dma.hbm_to_vmem [thread:$0]  %s1536_s10, 4096, %s79_s28, [#allocation9], %s1298_s23, %s1298_s23, %s1299_s24  }
  0x25   :  { %s1201_s29 = scalar_lea.hbm %s1529_s3, 4096 }
  0x26   :  { %p1202_p2 = scmp.ne.s32.totalorder %s1529_s3, %s1201_s29  ;;  %p1205_p3 = scmp.lt.u32.totalorder %s1201_s29, %s1529_s3 }
  0x28   :  { %p1207_p4 = pnand %p1205_p3, %p1202_p2 }
  0x2a   :  { %1210 = shalt.err (!%p1207_p4)
}
  0x2b   :  { %s1211_s20 = scalar_lea.vmem %s35_s15, 4096  ;;  %p1216_p6 = scmp.lt.s32.totalorder %s35_s15, %s35_s15 }
  0x2c   :  { %p1212_p5 = scmp.ne.s32.totalorder %s35_s15, %s1211_s20  ;;  %p1217_p7 = scmp.lt.s32.totalorder %s1211_s20, %s1211_s20 }
  0x2e   :  { %p1218_p8 = por %p1217_p7, %p1216_p6 }
  0x30   :  { %p1219_p9 = pnand %p1218_p8, %p1212_p5 }
  0x32   :  { %1222 = shalt.err (!%p1219_p9)
}
  0x33   :  { %s1302_s10 = smov 256   ;;  %s1303_s23 = smov 16  }
  0x34   :  { %40 = dma.hbm_to_vmem [thread:$0]  %s1529_s3, 4096, %s35_s15, [#allocation3], %s1302_s10, %s1302_s10, %s1303_s23  }
  0x35   :  { %s1304_s21 = smov [#allocation7]   ;;  %s1305_s5 = smov [#allocation10]  }
  0x36   :  { %s64_s22 = sshll.u32 %s1304_s21, 4  ;;  %s92_s30 = sshll.u32 %s1305_s5, 4  ;;  %s65_s22 = int_to_ptr.vmem [resolvable:$true] %s64_s22  ;;  %s93_s30 = int_to_ptr.vmem [resolvable:$true] %s92_s30 }
  0x37   :  { %s1223_s27 = scalar_lea.hbm %s1534_s8, 4096 }
  0x38   :  { %p1224_p10 = scmp.ne.s32.totalorder %s1534_s8, %s1223_s27  ;;  %p1227_p11 = scmp.lt.u32.totalorder %s1223_s27, %s1534_s8 }
  0x3a   :  { %p1229_p12 = pnand %p1227_p11, %p1224_p10 }
  0x3c   :  { %1232 = shalt.err (!%p1229_p12)
}
  0x3d   :  { %s1233_s3 = scalar_lea.vmem %s65_s22, 4096  ;;  %p1238_p0 = scmp.lt.s32.totalorder %s65_s22, %s65_s22 }
  0x3e   :  { %p1234_p13 = scmp.ne.s32.totalorder %s65_s22, %s1233_s3  ;;  %p1239_p1 = scmp.lt.s32.totalorder %s1233_s3, %s1233_s3 }
  0x40   :  { %p1240_p2 = por %p1239_p1, %p1238_p0 }
  0x42   :  { %p1241_p3 = pnand %p1240_p2, %p1234_p13 }
  0x44   :  { %1244 = shalt.err (!%p1241_p3)
}
  0x45   :  { %70 = dma.hbm_to_vmem [thread:$0]  %s1534_s8, 4096, %s65_s22, [#allocation6], %s1302_s10, %s1302_s10, %s1303_s23  }
  0x46   :  { %s1245_s28 = scalar_lea.hbm %s1538_s12, 512 }
  0x47   :  { %p1246_p4 = scmp.ne.s32.totalorder %s1538_s12, %s1245_s28  ;;  %p1249_p5 = scmp.lt.u32.totalorder %s1245_s28, %s1538_s12 }
  0x49   :  { %p1251_p6 = pnand %p1249_p5, %p1246_p4 }
  0x4b   :  { %1254 = shalt.err (!%p1251_p6)
}
  0x4c   :  { %s1255_s27 = scalar_lea.vmem %s93_s30, 512  ;;  %p1260_p8 = scmp.lt.s32.totalorder %s93_s30, %s93_s30 }
  0x4d   :  { %p1256_p7 = scmp.ne.s32.totalorder %s93_s30, %s1255_s27  ;;  %p1261_p9 = scmp.lt.s32.totalorder %s1255_s27, %s1255_s27 }
  0x4f   :  { %p1262_p10 = por %p1261_p9, %p1260_p8 }
  0x51   :  { %p1263_p11 = pnand %p1262_p10, %p1256_p7 }
  0x53   :  { %1266 = shalt.err (!%p1263_p11)
}
  0x54   :  { %98 = dma.hbm_to_vmem [thread:$0]  %s1538_s12, 512, %s93_s30, [#allocation9], %s1302_s10, %s1302_s10, %s1303_s23  }
  0x55   :  { %1289 = dma.done.wait [#allocation3], 4096  }
  0x56   :  { %1290 = vsyncadd [#allocation3], 4294963200 }
  0x57   :  { %1291 = dma.done.wait [#allocation6], 8192  }
  0x58   :  { %1292 = vsyncadd [#allocation6], 4294959104 }
  0x59   :  { %1293 = dma.done.wait [#allocation9], 4608  }
  0x5a   :  { %1294 = vsyncadd [#allocation9], 4294962688  ;;  %v1306_v0 = vmov 0.0|0.0   ;;  %vm1307_vm0 = vmmov 0   ;;  %v1308_v1 = vmov 0.0   ;;  %v117_v2 = vld [vmem:[%s1527_s1] sm:$0xff] }
  0x5b   :  { %997 = vmatprep.subr.bf16.mxu0 %v1306_v0  ;;  %987 = vmatprep.mubr.msk.f32.mxu0 %vm1307_vm0, %v1308_v1  ;;  %v118_v3 = vld [vmem:[%s1527_s1 + $0x8] sm:$0xff]  ;;  %v119_v4 = vld [vmem:[%s1527_s1 + $0x10] sm:$0xff]  ;;  %v120_v6 = vld [vmem:[%s1527_s1 + $0x18] sm:$0xff]  ;;  %vm128_vm1 = vcmask 261120   ;;  %vm682_vm8 = vcmask 1041408   ;;  %vm788_vm9 = vcmask 130048  }
  0x5c   :  { %310 = vmatprep.mubr.f32.mxu1 %v1308_v1  ;;  %v998_v5 = vpack.c.bf16 %v118_v3, %v117_v2  ;;  %v203_v7 = vld [vmem:[#allocation2 + $0x8] sm:$0xff]  ;;  %v205_v8 = vld [vmem:[#allocation2 + $0x18] sm:$0xff]  ;;  %v202_v9 = vld [vmem:[#allocation2] sm:$0xff]  ;;  %v1001_v11 = vpack.c.bf16 %v120_v6, %v119_v4  ;;  %s1309_s27 = smov [#allocation11]  }
  0x5d   :  { %v204_v10 = vld [vmem:[#allocation2 + $0x10] sm:$0xff]  ;;  %v1003_v12 = vpack.c.bf16 %v205_v8, %v203_v7  ;;  %v207_v14 = vld [vmem:[#allocation2 + $0x28] sm:$0xff]  ;;  %v209_v15 = vld [vmem:[#allocation2 + $0x38] sm:$0xff]  ;;  %s881_s8 = sshll.u32 %s1309_s27, 4  ;;  %s882_s8 = int_to_ptr.vmem [resolvable:$true] %s881_s8 }
  0x5e   :  { %999 = vmatpush3.bf16.msra.mxu0 %v998_v5  ;;  %v1005_v13 = vpack.c.bf16 %v204_v10, %v202_v9  ;;  %v206_v16 = vld [vmem:[#allocation2 + $0x20] sm:$0xff]  ;;  %v1007_v17 = vpack.c.bf16 %v209_v15, %v207_v14  ;;  %v208_v18 = vld [vmem:[#allocation2 + $0x30] sm:$0xff]  ;;  %v211_v19 = vld [vmem:[#allocation2 + $0x48] sm:$0xff]  ;;  %s1267_s22 = scalar_lea.vmem %s882_s8, 64  ;;  %p1272_p13 = scmp.lt.s32.totalorder %s882_s8, %s882_s8 }
  0x5f   :  { %1000 = vmatprep.subr.bf16.mxu0 %v1306_v0  ;;  %v213_v20 = vld [vmem:[#allocation2 + $0x58] sm:$0xff]  ;;  %1004 = vmatprep.subr.bf16.mxu1 %v1003_v12  ;;  %v1009_v21 = vpack.c.bf16 %v208_v18, %v206_v16  ;;  %v116_v22 = vld [vmem:[%s1526_s0] sm:$0x3]  ;;  %v212_v25 = vld [vmem:[#allocation2 + $0x50] sm:$0xff]  ;;  %p1268_p12 = scmp.ne.s32.totalorder %s882_s8, %s1267_s22  ;;  %p1273_p0 = scmp.lt.s32.totalorder %s1267_s22, %s1267_s22 }
  0x60   :  { %1006 = vmatpush1.bf16.msra.mxu1 %v1005_v13  ;;  %v1011_v23 = vpack.c.bf16 %v213_v20, %v211_v19  ;;  %v210_v24 = vld [vmem:[#allocation2 + $0x40] sm:$0xff]  ;;  %v215_v26 = vld [vmem:[#allocation2 + $0x68] sm:$0xff]  ;;  %v217_v27 = vld [vmem:[#allocation2 + $0x78] sm:$0xff] }
  0x61   :  { %1008 = vmatprep.subr.bf16.mxu1 %v1007_v17  ;;  %v1013_v28 = vpack.c.bf16 %v212_v25, %v210_v24  ;;  %v1015_v29 = vpack.c.bf16 %v217_v27, %v215_v26  ;;  %v214_v30 = vld [vmem:[#allocation2 + $0x60] sm:$0xff]  ;;  %v216_v31 = vld [vmem:[#allocation2 + $0x70] sm:$0xff]  ;;  %v219_v32 = vld [vmem:[#allocation2 + $0x88] sm:$0xff]  ;;  %p1274_p1 = por %p1273_p0, %p1272_p13 }
  0x62   :  { %1002 = vmatpush3.bf16.msra.mxu0 %v1001_v11  ;;  %v221_v33 = vld [vmem:[#allocation2 + $0x98] sm:$0xff]  ;;  %v1017_v34 = vpack.c.bf16 %v216_v31, %v214_v30  ;;  %v218_v36 = vld [vmem:[#allocation2 + $0x80] sm:$0xff]  ;;  %v220_v37 = vld [vmem:[#allocation2 + $0x90] sm:$0xff] }
  0x63   :  { %v1019_v35 = vpack.c.bf16 %v221_v33, %v219_v32  ;;  %v223_v38 = vld [vmem:[#allocation2 + $0xa8] sm:$0xff]  ;;  %v225_v39 = vld [vmem:[#allocation2 + $0xb8] sm:$0xff]  ;;  %v1021_v40 = vpack.c.bf16 %v220_v37, %v218_v36  ;;  %v222_v42 = vld [vmem:[#allocation2 + $0xa0] sm:$0xff]  ;;  %p1275_p2 = pnand %p1274_p1, %p1268_p12 }
  0x64   :  { %1010 = vmatpush1.bf16.msra.mxu1 %v1009_v21  ;;  %v1023_v41 = vpack.c.bf16 %v225_v39, %v223_v38  ;;  %v224_v43 = vld [vmem:[#allocation2 + $0xb0] sm:$0xff]  ;;  %v227_v44 = vld [vmem:[#allocation2 + $0xc8] sm:$0xff]  ;;  %v229_v45 = vld [vmem:[#allocation2 + $0xd8] sm:$0xff] }
  0x65   :  { %988 = vmatmul.mubr.msk.f32.vlgmr.msra.gmra.mrb[0].mxu0 %vm128_vm1, %v116_v22  ;;  %1012 = vmatprep.subr.bf16.mxu1 %v1011_v23  ;;  %v1025_v46 = vpack.c.bf16 %v224_v43, %v222_v42  ;;  %v1027_v47 = vpack.c.bf16 %v229_v45, %v227_v44  ;;  %v226_v48 = vld [vmem:[#allocation2 + $0xc0] sm:$0xff]  ;;  %v228_v49 = vld [vmem:[#allocation2 + $0xd0] sm:$0xff]  ;;  %v231_v50 = vld [vmem:[#allocation2 + $0xe8] sm:$0xff] }
  0x66   :  { %v233_v51 = vld [vmem:[#allocation2 + $0xf8] sm:$0xff]  ;;  %v1029_v52 = vpack.c.bf16 %v228_v49, %v226_v48  ;;  %v230_v54 = vld [vmem:[#allocation2 + $0xe0] sm:$0xff]  ;;  %v232_v55 = vld [vmem:[#allocation2 + $0xf0] sm:$0xff] }
  0x67   :  { %v1031_v53 = vpack.c.bf16 %v233_v51, %v231_v50  ;;  %v1033_v56 = vpack.c.bf16 %v232_v55, %v230_v54  ;;  %v435_v57 = vld [vmem:[#allocation7 + $0x8] sm:$0xff]  ;;  %v437_v58 = vld [vmem:[#allocation7 + $0x18] sm:$0xff]  ;;  %v339_v60 = vld [vmem:[#allocation5 + $0x80] sm:$0xff] }
  0x68   :  { %1014 = vmatpush1.bf16.msra.mxu1 %v1013_v28  ;;  %v1067_v59 = vpack.c.bf16 %v437_v58, %v435_v57  ;;  %v340_v61 = vld [vmem:[#allocation5 + $0x88] sm:$0xff]  ;;  %v323_v62 = vld [vmem:[#allocation5] sm:$0xff]  ;;  %v341_v3 = vld [vmem:[#allocation5 + $0x90] sm:$0xff] }
  0x69   :  { %1016 = vmatprep.subr.bf16.mxu1 %v1015_v29  ;;  %v1035_v63 = vpack.c.bf16 %v340_v61, %v339_v60  ;;  %v324_v2 = vld [vmem:[#allocation5 + $0x8] sm:$0xff]  ;;  %v342_v4 = vld [vmem:[#allocation5 + $0x98] sm:$0xff]  ;;  %v325_v7 = vld [vmem:[#allocation5 + $0x10] sm:$0xff] }
  0x6a   :  { %v1037_v5 = vpack.c.bf16 %v324_v2, %v323_v62  ;;  %v1039_v6 = vpack.c.bf16 %v342_v4, %v341_v3  ;;  %v326_v8 = vld [vmem:[#allocation5 + $0x18] sm:$0xff]  ;;  %v343_v9 = vld [vmem:[#allocation5 + $0xa0] sm:$0xff]  ;;  %v344_v10 = vld [vmem:[#allocation5 + $0xa8] sm:$0xff] }
  0x6b   :  { %1036 = vmatprep.subr.bf16.mxu0 %v1035_v63  ;;  %v1041_v11 = vpack.c.bf16 %v326_v8, %v325_v7  ;;  %v1043_v12 = vpack.c.bf16 %v344_v10, %v343_v9  ;;  %v327_v13 = vld [vmem:[#allocation5 + $0x20] sm:$0xff]  ;;  %v328_v14 = vld [vmem:[#allocation5 + $0x28] sm:$0xff]  ;;  %v345_v15 = vld [vmem:[#allocation5 + $0xb0] sm:$0xff] }
  0x6c   :  { %1018 = vmatpush1.bf16.msra.mxu1 %v1017_v34  ;;  %1038 = vmatpush3.bf16.msra.mxu0 %v1037_v5  ;;  %v346_v16 = vld [vmem:[#allocation5 + $0xb8] sm:$0xff]  ;;  %v1045_v17 = vpack.c.bf16 %v328_v14, %v327_v13  ;;  %v329_v19 = vld [vmem:[#allocation5 + $0x30] sm:$0xff]  ;;  %v347_v21 = vld [vmem:[#allocation5 + $0xc0] sm:$0xff] }
  0x6d   :  { %1020 = vmatprep.subr.bf16.mxu1 %v1019_v35  ;;  %1040 = vmatprep.subr.bf16.mxu0 %v1039_v6  ;;  %v1047_v18 = vpack.c.bf16 %v346_v16, %v345_v15  ;;  %v330_v20 = vld [vmem:[#allocation5 + $0x38] sm:$0xff]  ;;  %v348_v22 = vld [vmem:[#allocation5 + $0xc8] sm:$0xff]  ;;  %v331_v25 = vld [vmem:[#allocation5 + $0x40] sm:$0xff] }
  0x6e   :  { %v1049_v23 = vpack.c.bf16 %v330_v20, %v329_v19  ;;  %v1051_v24 = vpack.c.bf16 %v348_v22, %v347_v21  ;;  %v332_v26 = vld [vmem:[#allocation5 + $0x48] sm:$0xff]  ;;  %v349_v27 = vld [vmem:[#allocation5 + $0xd0] sm:$0xff]  ;;  %v350_v28 = vld [vmem:[#allocation5 + $0xd8] sm:$0xff] }
  0x6f   :  { %v1053_v29 = vpack.c.bf16 %v332_v26, %v331_v25  ;;  %v1055_v30 = vpack.c.bf16 %v350_v28, %v349_v27  ;;  %v333_v31 = vld [vmem:[#allocation5 + $0x50] sm:$0xff]  ;;  %v334_v32 = vld [vmem:[#allocation5 + $0x58] sm:$0xff]  ;;  %v351_v33 = vld [vmem:[#allocation5 + $0xe0] sm:$0xff] }
  0x70   :  { %1022 = vmatpush1.bf16.msra.mxu1 %v1021_v40  ;;  %1042 = vmatpush3.bf16.msra.mxu0 %v1041_v11  ;;  %v352_v34 = vld [vmem:[#allocation5 + $0xe8] sm:$0xff]  ;;  %v1057_v35 = vpack.c.bf16 %v334_v32, %v333_v31  ;;  %v434_v37 = vld [vmem:[#allocation7] sm:$0xff]  ;;  %v436_v38 = vld [vmem:[#allocation7 + $0x10] sm:$0xff] }
  0x71   :  { %1024 = vmatprep.subr.bf16.mxu1 %v1023_v41  ;;  %1044 = vmatprep.subr.bf16.mxu0 %v1043_v12  ;;  %v1059_v36 = vpack.c.bf16 %v352_v34, %v351_v33  ;;  %v892_v39 = vld [vmem:[%s1528_s2] ss:$0 sm:$0xff]  ;;  %v439_v40 = vld [vmem:[#allocation7 + $0x28] sm:$0xff]  ;;  %v441_v41 = vld [vmem:[#allocation7 + $0x38] sm:$0xff]  ;;  %v1069_v43 = vpack.c.bf16 %v436_v38, %v434_v37  ;;  %v236_v37 = vlaneseq }
  0x72   :  { %v440_v48 = vld [vmem:[#allocation7 + $0x30] sm:$0xff]  ;;  %v443_v49 = vld [vmem:[#allocation7 + $0x48] sm:$0xff]  ;;  %v445_v50 = vld [vmem:[#allocation7 + $0x58] sm:$0xff] }
  0x73   :  { %v444_v54 = vld [vmem:[#allocation7 + $0x50] sm:$0xff]  ;;  %v447_v55 = vld [vmem:[#allocation7 + $0x68] sm:$0xff]  ;;  %v453_v62 = vld [vmem:[#allocation7 + $0x98] sm:$0xff]  ;;  %v237_v38 = vshrl.u32 %v236_v37, 7 }
  0x74   :  { %1026 = vmatpush1.bf16.msra.mxu1 %v1025_v46  ;;  %1046 = vmatpush3.bf16.msra.mxu0 %v1045_v17  ;;  %v1071_v46 = vpack.c.bf16 %v441_v41, %v439_v40  ;;  %v448_v60 = vld [vmem:[#allocation7 + $0x70] sm:$0xff]  ;;  %v451_v61 = vld [vmem:[#allocation7 + $0x88] sm:$0xff]  ;;  %v450_v3 = vld [vmem:[#allocation7 + $0x80] sm:$0xff] }
  0x75   :  { %1028 = vmatprep.subr.bf16.mxu1 %v1027_v47  ;;  %1048 = vmatprep.subr.bf16.mxu0 %v1047_v18  ;;  %v438_v47 = vld [vmem:[#allocation7 + $0x20] sm:$0xff]  ;;  %v1083_v2 = vpack.c.bf16 %v453_v62, %v451_v61  ;;  %v452_v4 = vld [vmem:[#allocation7 + $0x90] sm:$0xff]  ;;  %v455_v5 = vld [vmem:[#allocation7 + $0xa8] sm:$0xff]  ;;  %v1493_v41 = vsub.s32 1, %v237_v38 }
  0x76   :  { %v1073_v51 = vpack.c.bf16 %v440_v48, %v438_v47  ;;  %v457_v6 = vld [vmem:[#allocation7 + $0xb8] sm:$0xff]  ;;  %v1085_v7 = vpack.c.bf16 %v452_v4, %v450_v3  ;;  %v454_v9 = vld [vmem:[#allocation7 + $0xa0] sm:$0xff]  ;;  %v456_v10 = vld [vmem:[#allocation7 + $0xb0] sm:$0xff] }
  0x77   :  { %v1087_v8 = vpack.c.bf16 %v457_v6, %v455_v5  ;;  %v459_v11 = vld [vmem:[#allocation7 + $0xc8] sm:$0xff]  ;;  %v461_v12 = vld [vmem:[#allocation7 + $0xd8] sm:$0xff]  ;;  %v1089_v13 = vpack.c.bf16 %v456_v10, %v454_v9  ;;  %v458_v15 = vld [vmem:[#allocation7 + $0xc0] sm:$0xff] }
  0x78   :  { %1030 = vmatpush1.bf16.msra.mxu1 %v1029_v52  ;;  %1050 = vmatpush3.bf16.msra.mxu0 %v1049_v23  ;;  %v1075_v52 = vpack.c.bf16 %v445_v50, %v443_v49  ;;  %v1091_v14 = vpack.c.bf16 %v461_v12, %v459_v11  ;;  %v460_v16 = vld [vmem:[#allocation7 + $0xd0] sm:$0xff]  ;;  %v463_v17 = vld [vmem:[#allocation7 + $0xe8] sm:$0xff]  ;;  %v465_v18 = vld [vmem:[#allocation7 + $0xf8] sm:$0xff] }
  0x79   :  { %1032 = vmatprep.subr.bf16.mxu1 %v1031_v53  ;;  %1052 = vmatprep.subr.bf16.mxu0 %v1051_v24  ;;  %v442_v53 = vld [vmem:[#allocation7 + $0x40] sm:$0xff]  ;;  %v1093_v19 = vpack.c.bf16 %v460_v16, %v458_v15  ;;  %v1095_v20 = vpack.c.bf16 %v465_v18, %v463_v17  ;;  %v464_v22 = vld [vmem:[#allocation7 + $0xf0] sm:$0xff]  ;;  %v433_v25 = vld [vmem:[%s1533_s7 + $0x8] sm:$0xff] }
  0x7a   :  { %v1077_v57 = vpack.c.bf16 %v444_v54, %v442_v53  ;;  %v462_v21 = vld [vmem:[#allocation7 + $0xe0] sm:$0xff]  ;;  %v336_v27 = vld [vmem:[#allocation5 + $0x68] sm:$0xff]  ;;  %v337_v32 = vld [vmem:[#allocation5 + $0x70] sm:$0xff] }
  0x7b   :  { %v1097_v23 = vpack.c.bf16 %v464_v22, %v462_v21  ;;  %v432_v24 = vld [vmem:[%s1533_s7] sm:$0xff]  ;;  %v568_v49 = vld [vmem:[#allocation8 + $0x8] sm:$0xff]  ;;  %v589_v4 = vld [vmem:[#allocation8 + $0xb0] sm:$0xff] }
  0x7c   :  { %1034 = vmatpush1.bf16.msra.mxu1 %v1033_v56  ;;  %1054 = vmatpush3.bf16.msra.mxu0 %v1053_v29  ;;  %v449_v56 = vld [vmem:[#allocation7 + $0x78] sm:$0xff]  ;;  %v335_v26 = vld [vmem:[#allocation5 + $0x60] sm:$0xff]  ;;  %v353_v29 = vld [vmem:[#allocation5 + $0xf0] sm:$0xff] }
  0x7d   :  { %1068 = vmatprep.subr.bf16.mxu1 %v1067_v59  ;;  %1056 = vmatprep.subr.bf16.mxu0 %v1055_v30  ;;  %v1079_v58 = vpack.c.bf16 %v449_v56, %v447_v55  ;;  %v446_v59 = vld [vmem:[#allocation7 + $0x60] sm:$0xff]  ;;  %v1061_v28 = vpack.c.bf16 %v336_v27, %v335_v26  ;;  %v354_v30 = vld [vmem:[#allocation5 + $0xf8] sm:$0xff]  ;;  %v588_v61 = vld [vmem:[#allocation8 + $0xa8] sm:$0xff] }
  0x7e   :  { %v1081_v63 = vpack.c.bf16 %v448_v60, %v446_v59  ;;  %v1063_v31 = vpack.c.bf16 %v354_v30, %v353_v29  ;;  %v583_v34 = vld [vmem:[#allocation8 + $0x80] sm:$0xff]  ;;  %v572_v3 = vld [vmem:[#allocation8 + $0x28] sm:$0xff]  ;;  %v590_v5 = vld [vmem:[#allocation8 + $0xb8] sm:$0xff] }
  0x7f   :  { %v234_v40 = vld [vmem:[%s1530_s4] sm:$0x3]  ;;  %v574_v9 = vld [vmem:[#allocation8 + $0x38] sm:$0xff]  ;;  %v592_v11 = vld [vmem:[#allocation8 + $0xc8] sm:$0xff] }
  0x80   :  { %1058 = vmatpush3.bf16.msra.mxu0 %v1057_v35  ;;  %v584_v35 = vld [vmem:[#allocation8 + $0x88] sm:$0xff]  ;;  %v567_v48 = vld [vmem:[#allocation8] sm:$0xff]  ;;  %v593_v16 = vld [vmem:[#allocation8 + $0xd0] sm:$0xff] }
  0x81   :  { %1060 = vmatprep.subr.bf16.mxu0 %v1059_v36  ;;  %v1099_v36 = vpack.c.bf16 %v584_v35, %v583_v34  ;;  %v1101_v54 = vpack.c.bf16 %v568_v49, %v567_v48  ;;  %v587_v60 = vld [vmem:[#allocation8 + $0xa0] sm:$0xff]  ;;  %v576_v15 = vld [vmem:[#allocation8 + $0x48] sm:$0xff]  ;;  %v594_v17 = vld [vmem:[#allocation8 + $0xd8] sm:$0xff] }
  0x82   :  { %v591_v10 = vld [vmem:[#allocation8 + $0xc0] sm:$0xff]  ;;  %v578_v21 = vld [vmem:[#allocation8 + $0x58] sm:$0xff]  ;;  %v597_v29 = vld [vmem:[#allocation8 + $0xf0] sm:$0xff] }
  0x83   :  { %v595_v22 = vld [vmem:[#allocation8 + $0xe0] sm:$0xff]  ;;  %v598_v30 = vld [vmem:[#allocation8 + $0xf8] sm:$0xff]  ;;  %v581_v34 = vld [vmem:[#allocation8 + $0x70] sm:$0xff] }
  0x84   :  { %1062 = vmatpush3.bf16.msra.mxu0 %v1061_v28  ;;  %v579_v27 = vld [vmem:[#allocation8 + $0x60] sm:$0xff]  ;;  %v580_v28 = vld [vmem:[#allocation8 + $0x68] sm:$0xff]  ;;  %v582_v35 = vld [vmem:[#allocation8 + $0x78] sm:$0xff] }
  0x85   :  { %1064 = vmatprep.subr.bf16.mxu0 %v1063_v31 }
 0x138   :  { %v198_v42 = vpop.f32.mrb[0].mxu0 }
 0x139   :  { %v199_v44 = vadd.f32 %v892_v39, %v198_v42  ;;  %v989_v45 = vpop.f32.mrb[1].mxu0  ;;  %v1488_v39 = vsub.s32 0, %v237_v38 }
 0x13b   :  { %311 = vmatmul.mubr.f32.vlgmr.msra.gmra.mrb[0].mxu1 %v199_v44  ;;  %v239_v42 = vrot.slane %v234_v40, %v1488_v39 }
 0x13c   :  { %1070 = vmatpush1.bf16.msra.mxu1 %v1069_v43  ;;  %542 = vmatprep.mubr.f32.mxu1 %v1308_v1  ;;  %v243_v43 = vrot.slane %v234_v40, %v1493_v41  ;;  %v1129_v40 = vpack.c.bf16 %v582_v35, %v581_v34 }
 0x13d   :  { %1072 = vmatprep.subr.bf16.mxu1 %v1071_v46 }
 0x140   :  { %1074 = vmatpush1.bf16.msra.mxu1 %v1073_v51  ;;  %v585_v51 = vld [vmem:[#allocation8 + $0x90] sm:$0xff] }
 0x141   :  { %1076 = vmatprep.subr.bf16.mxu1 %v1075_v52  ;;  %v586_v52 = vld [vmem:[#allocation8 + $0x98] sm:$0xff] }
 0x142   :  { %v1103_v56 = vpack.c.bf16 %v586_v52, %v585_v51 }
 0x144   :  { %1078 = vmatpush1.bf16.msra.mxu1 %v1077_v57  ;;  %v569_v57 = vld [vmem:[#allocation8 + $0x10] sm:$0xff] }
 0x145   :  { %1080 = vmatprep.subr.bf16.mxu1 %v1079_v58  ;;  %v570_v58 = vld [vmem:[#allocation8 + $0x18] sm:$0xff] }
 0x146   :  { %v1105_v62 = vpack.c.bf16 %v570_v58, %v569_v57 }
 0x148   :  { %1082 = vmatpush1.bf16.msra.mxu1 %v1081_v63  ;;  %v1107_v63 = vpack.c.bf16 %v588_v61, %v587_v60 }
 0x149   :  { %1084 = vmatprep.subr.bf16.mxu1 %v1083_v2  ;;  %v571_v2 = vld [vmem:[#allocation8 + $0x20] sm:$0xff] }
 0x14a   :  { %v1109_v6 = vpack.c.bf16 %v572_v3, %v571_v2  ;;  %v895_v2 = vld [vmem:[%s1537_s11] ss:$0 sm:$0xff] }
 0x14c   :  { %1086 = vmatpush1.bf16.msra.mxu1 %v1085_v7  ;;  %v1111_v7 = vpack.c.bf16 %v590_v5, %v589_v4 }
 0x14d   :  { %1088 = vmatprep.subr.bf16.mxu1 %v1087_v8  ;;  %v573_v8 = vld [vmem:[#allocation8 + $0x30] sm:$0xff] }
 0x14e   :  { %v1113_v12 = vpack.c.bf16 %v574_v9, %v573_v8 }
 0x150   :  { %1090 = vmatpush1.bf16.msra.mxu1 %v1089_v13  ;;  %v1115_v13 = vpack.c.bf16 %v592_v11, %v591_v10 }
 0x151   :  { %1092 = vmatprep.subr.bf16.mxu1 %v1091_v14  ;;  %v575_v14 = vld [vmem:[#allocation8 + $0x40] sm:$0xff] }
 0x152   :  { %v1117_v18 = vpack.c.bf16 %v576_v15, %v575_v14 }
 0x154   :  { %1094 = vmatpush1.bf16.msra.mxu1 %v1093_v19  ;;  %v1119_v19 = vpack.c.bf16 %v594_v17, %v593_v16 }
 0x155   :  { %1096 = vmatprep.subr.bf16.mxu1 %v1095_v20  ;;  %v577_v20 = vld [vmem:[#allocation8 + $0x50] sm:$0xff] }
 0x158   :  { %1098 = vmatpush1.bf16.msra.mxu1 %v1097_v23  ;;  %v596_v23 = vld [vmem:[#allocation8 + $0xe8] sm:$0xff] }
 0x159   :  { %1131 = vmatprep.subr.bf16.mxu1 %v1306_v0  ;;  %v338_v0 = vld [vmem:[#allocation5 + $0x78] sm:$0xff]  ;;  %v1123_v26 = vpack.c.bf16 %v596_v23, %v595_v22 }
 0x15a   :  { %v1065_v33 = vpack.c.bf16 %v338_v0, %v337_v32  ;;  %v1125_v32 = vpack.c.bf16 %v580_v28, %v579_v27  ;;  %v772_v27 = vld [vmem:[#allocation10] sm:$0xff]  ;;  %v774_v28 = vld [vmem:[#allocation10 + $0x10] sm:$0xff] }
 0x15b   :  { %543 = vmatmul.mubr.f32.vlgmr.msra.gmra.mrb[2].mxu1 %v432_v24  ;;  %v1121_v24 = vpack.c.bf16 %v578_v21, %v577_v20 }
 0x15c   :  { %548 = vmatprep.mubr.f32.mxu1 %v1308_v1  ;;  %1066 = vmatpush3.bf16.msra.mxu0 %v1065_v33  ;;  %v1127_v33 = vpack.c.bf16 %v598_v30, %v597_v29  ;;  %v1136_v29 = vpack.c.bf16 %v774_v28, %v772_v27 }
 0x15d   :  { %1100 = vmatprep.subr.bf16.mxu0 %v1099_v36 }
 0x15f   :  { %549 = vmatmul.mubr.f32.gmra.mrb[4].mxu1 %v433_v25  ;;  %v466_v25 = vld [vmem:[%s1535_s9] sm:$0x3] }
 0x160   :  { %994 = vmatprep.mubr.msk.f32.mxu1 %vm1307_vm0, %v1308_v1  ;;  %v471_v31 = vrot.slane %v466_v25, %v1488_v39  ;;  %v475_v0 = vrot.slane %v466_v25, %v1493_v41 }
 0x20e   :  { %v312_v44 = vpop.f32.mrb[0].mxu1 }
 0x20f   :  { %v313_v45 = vadd.f32 %v312_v44, %v239_v42  ;;  %v314_v46 = vpop.f32.mrb[1].mxu1 }
 0x210   :  { %v315_v47 = vadd.f32 %v314_v46, %v243_v43 }
 0x211   :  { %v319_v50 = vmul.f32 0.01, %v313_v45  ;;  %vm317_vm2 = vcmp.ge.f32.partialorder %v313_v45, 0.0 }
 0x212   :  { %v320_v53 = vmul.f32 0.01, %v315_v47  ;;  %vm318_vm3 = vcmp.ge.f32.partialorder %v315_v47, 0.0 }
 0x213   :  { %v321_v59 = vsel %vm317_vm2, %v313_v45, %v319_v50 }
 0x214   :  { %v322_v55 = vsel %vm318_vm3, %v315_v47, %v320_v53 }
 0x215   :  { %426 = vmatprep.mubr.f32.mxu0 %v322_v55 }
 0x216   :  { %427 = vmatmul.mubr.f32.vlgmr.msra.gmra.mrb[2].mxu0 %v321_v59 }
 0x217   :  { %1102 = vmatpush3.bf16.msra.mxu0 %v1101_v54 }
 0x218   :  { %1104 = vmatprep.subr.bf16.mxu0 %v1103_v56  ;;  %v894_v56 = vld [vmem:[%s1532_s6] ss:$0 sm:$0xff] }
 0x21b   :  { %1106 = vmatpush3.bf16.msra.mxu0 %v1105_v62 }
 0x21c   :  { %1108 = vmatprep.subr.bf16.mxu0 %v1107_v63 }
 0x21f   :  { %1110 = vmatpush3.bf16.msra.mxu0 %v1109_v6 }
 0x220   :  { %1112 = vmatprep.subr.bf16.mxu0 %v1111_v7 }
 0x223   :  { %1114 = vmatpush3.bf16.msra.mxu0 %v1113_v12 }
 0x224   :  { %1116 = vmatprep.subr.bf16.mxu0 %v1115_v13 }
 0x227   :  { %1118 = vmatpush3.bf16.msra.mxu0 %v1117_v18  ;;  %v773_v18 = vld [vmem:[#allocation10 + $0x8] sm:$0xff] }
 0x228   :  { %1120 = vmatprep.subr.bf16.mxu0 %v1119_v19  ;;  %v775_v19 = vld [vmem:[#allocation10 + $0x18] sm:$0xff] }
 0x229   :  { %v1134_v23 = vpack.c.bf16 %v775_v19, %v773_v18 }
 0x22b   :  { %1122 = vmatpush3.bf16.msra.mxu0 %v1121_v24 }
 0x22c   :  { %1124 = vmatprep.subr.bf16.mxu0 %v1123_v26 }
 0x22e   :  { %v544_v36 = vpop.f32.mrb[2].mxu1 }
 0x22f   :  { %v545_v37 = vadd.f32 %v544_v36, %v471_v31  ;;  %v546_v38 = vpop.f32.mrb[3].mxu1  ;;  %1126 = vmatpush3.bf16.msra.mxu0 %v1125_v32 }
 0x230   :  { %v547_v42 = vadd.f32 %v546_v38, %v475_v0  ;;  %1128 = vmatprep.subr.bf16.mxu0 %v1127_v33 }
 0x231   :  { %v559_v43 = vmul.f32 0.01, %v545_v37  ;;  %vm555_vm4 = vcmp.ge.f32.partialorder %v545_v37, 0.0 }
 0x232   :  { %v560_v44 = vmul.f32 0.01, %v547_v42  ;;  %v550_v45 = vpop.f32.mrb[4].mxu1  ;;  %vm556_vm5 = vcmp.ge.f32.partialorder %v547_v42, 0.0 }
 0x233   :  { %v551_v46 = vadd.f32 %v550_v45, %v471_v31  ;;  %v552_v47 = vpop.f32.mrb[5].mxu1  ;;  %1130 = vmatpush3.bf16.msra.mxu0 %v1129_v40  ;;  %v563_v51 = vsel %vm555_vm4, %v545_v37, %v559_v43 }
 0x234   :  { %v553_v48 = vadd.f32 %v552_v47, %v475_v0  ;;  %v564_v49 = vsel %vm556_vm5, %v547_v42, %v560_v44  ;;  %v776_v0 = vld [vmem:[%s1539_s13] sm:$0x3] }
 0x235   :  { %v561_v50 = vmul.f32 0.01, %v551_v46  ;;  %670 = vmatprep.mubr.f32.mxu0 %v564_v49  ;;  %vm557_vm7 = vcmp.ge.f32.partialorder %v551_v46, 0.0  ;;  %v781_v33 = vrot.slane %v776_v0, %v1488_v39  ;;  %v785_v34 = vrot.slane %v776_v0, %v1493_v41 }
 0x236   :  { %v562_v52 = vmul.f32 0.01, %v553_v48  ;;  %671 = vmatmul.mubr.f32.vlgmr.msra.gmra.mrb[4].mxu0 %v563_v51  ;;  %vm558_vm6 = vcmp.ge.f32.partialorder %v553_v48, 0.0 }
 0x237   :  { %v565_v54 = vsel %vm557_vm7, %v551_v46, %v561_v50 }
 0x238   :  { %v566_v53 = vsel %vm558_vm6, %v553_v48, %v562_v52 }
 0x239   :  { %675 = vmatprep.mubr.f32.mxu0 %v566_v53 }
 0x23a   :  { %676 = vmatmul.mubr.f32.gmra.mrb[6].mxu0 %v565_v54 }
 0x2e9   :  { %v935_v55 = vpop.f32.mrb[2].mxu0 }
 0x2ea   :  { %v936_v57 = vpop.f32.mrb[3].mxu0 }
 0x2eb   :  { %v937_v58 = vadd.f32 %v936_v57, %v935_v55 }
 0x2ed   :  { %v429_v59 = vadd.f32 %v937_v58, %v894_v56 }
 0x2ef   :  { %v681_v60 = vmul.f32 %v429_v59, %v429_v59 }
 0x2f1   :  { %v683_v61 = vsel %vm682_vm8, %v681_v60, 0.0 }
 0x2f2   :  { %684 = vadd.xlane.f32.xlu1 %v683_v61 }
 0x309   :  { %v970_v62 = vpop.f32.mrb[4].mxu0 }
 0x30a   :  { %v971_v63 = vpop.f32.mrb[5].mxu0 }
 0x30b   :  { %v972_v3 = vadd.f32 %v971_v63, %v970_v62 }
 0x30d   :  { %v973_v4 = vpop.f32.mrb[6].mxu0  ;;  %v673_v5 = vadd.f32 %v972_v3, %v895_v2 }
 0x30e   :  { %v974_v6 = vpop.f32.mrb[7].mxu0 }
 0x30f   :  { %v975_v7 = vadd.f32 %v974_v6, %v973_v4  ;;  %v688_v8 = vmul.f32 %v673_v5, %v673_v5 }
 0x311   :  { %v678_v9 = vadd.f32 %v975_v7, %v895_v2  ;;  %690 = vadd.xlane.f32.xlu0 %v688_v8 }
 0x313   :  { %v689_v10 = vmul.f32 %v678_v9, %v678_v9 }
 0x315   :  { %692 = vadd.xlane.f32.xlu0 %v689_v10 }
 0x37f   :  { %v685_v13 = vpop.xlane.xlu1 %684 }
 0x380   :  { %v686_v16 = vmax.f32 %v685_v13, 1e-16 }
 0x39e   :  { %v691_v11 = vpop.xlane.xlu0 %690 }
 0x39f   :  { %v694_v12 = vmax.f32 %v691_v11, 1e-16 }
 0x3a1   :  { %1151 = vrsqrt.f32 %v694_v12 }
 0x3a2   :  { %v693_v14 = vpop.xlane.xlu0 %692 }
 0x3a3   :  { %v695_v15 = vmax.f32 %v693_v14, 1e-16 }
 0x3a5   :  { %1153 = vrsqrt.f32 %v695_v15 }
 0x3a6   :  { %1155 = vrsqrt.f32 %v686_v16 }
 0x3ab   :  { %v1152_v17 = vpop.eup %1151 }
 0x3ac   :  { %v700_v21 = vmul.f32 %v1152_v17, %v673_v5 }
 0x3af   :  { %v1154_v20 = vpop.eup %1153 }
 0x3b0   :  { %v701_v22 = vmul.f32 %v1154_v20, %v678_v9  ;;  %v1156_v24 = vpop.eup %1155 }
 0x3b1   :  { %v698_v26 = vmul.f32 5.0, %v1156_v24 }
 0x3b2   :  { %v1132_v25 = vpack.c.bf16 %v701_v22, %v700_v21 }
 0x3b3   :  { %v699_v30 = vmul.f32 %v698_v26, %v429_v59 }
 0x3b4   :  { %1133 = vmatpush3.bf16.xpose.msra.mxu1 %v1132_v25 }
 0x3b5   :  { %1135 = vmatprep.subr.bf16.mxu1 %v1134_v23 }
 0x3bb   :  { %995 = vmatmul.mubr.f32.vlgmr.msra.gmra.mrb[6].mxu1 %v699_v30 }
 0x3bc   :  { %1137 = vmatpush1.bf16.msra.mxu1 %v1136_v29  ;;  %856 = vmatprep.mubr.f32.mxu1 %v1308_v1 }
 0x48e   :  { %v768_v31 = vpop.f32.mrb[6].mxu1 }
 0x48f   :  { %v996_v32 = vpop.f32.mrb[7].mxu1  ;;  %896 = vmatmul.mubr.msk.f32.vlgmr.msra.gmra.mrb[8].mxu1 %vm788_vm9, %v768_v31 }
 0x562   :  { %v858_v35 = vpop.f32.mrb[8].mxu1 }
 0x563   :  { %v859_v36 = vadd.f32 %v858_v35, %v781_v33  ;;  %v860_v37 = vpop.f32.mrb[9].mxu1 }
 0x564   :  { %v861_v38 = vadd.f32 %v860_v37, %v785_v34 }
 0x566   :  { %v865_v40 = vcombine.low %v859_v36, %v861_v38 }
 0x568   :  { %897 = vst.sshfl [vmem:[#allocation11] sm:$0x33 pattern:$0x76325410] %v865_v40 }
 0x569   :  { %1278 = shalt.err (!%p1275_p2)
}
 0x56a   :  { %s1279_s16 = scalar_lea.hbm %s1540_s14, 64 }
 0x56b   :  { %p1280_p3 = scmp.ne.s32.totalorder %s1540_s14, %s1279_s16  ;;  %p1283_p4 = scmp.lt.u32.totalorder %s1279_s16, %s1540_s14 }
 0x56d   :  { %p1285_p5 = pnand %p1283_p4, %p1280_p3 }
 0x56f   :  { %1288 = shalt.err (!%p1285_p5)
}
 0x570   :  { %884 = dma.vmem_to_hbm [thread:$0]  %s882_s8, 64, %s1540_s14, [#allocation4]  }
 0x571   :  { %1295 = dma.done.wait [#allocation4], 64  }
 0x572   :  { %1296 = vsyncadd [#allocation4], 4294967232 }
 0x573   :  { %888 = vsyncpa [#allocation3], 1 }
 0x574   :  { %889 = vsyncpa [#allocation6], 1 }
 0x575   :  { %890 = vsyncpa [#allocation9], 1 }
 0x576   :  { %891 = vsyncpa [#allocation4], 1 }

</bundles_post_ra>
